<compile_context>
chip_gen: v7x
topology: tpu7x:2x2x1
jax: 0.10.0
libtpu: 0.0.40
codegen_flags: <defaults>
</compile_context>

<pallas_src>
import functools

import jax
import jax.numpy as jnp
from jax.experimental import pallas as pl
from jax.experimental.pallas import tpu as pltpu

_EPS = 1e-6  # F.pairwise_distance default eps (added to the difference)


def _contrastive_loss_kernel(o1_ref, o2_ref, label_ref, loss_ref, acc_ref,
                             *, true_b: int, tile_b: int, margin: float):
    i = pl.program_id(0)

    @pl.when(i == 0)
    def _init():
        acc_ref[0] = jnp.float32(0.0)

    o1 = o1_ref[...].astype(jnp.float32)
    o2 = o2_ref[...].astype(jnp.float32)
    label = label_ref[...].astype(jnp.float32)                 # (TB, 1)

    diff = o1 - o2 + _EPS                                      # torch adds eps to the diff
    sq_dist = jnp.sum(diff * diff, axis=-1, keepdims=True)     # (TB, 1)
    dist = jnp.sqrt(sq_dist)                                   # euclidean_distance (EUP)
    margin_dist = jnp.maximum(margin - dist, 0.0)              # clamp(min=0)

    # (1-label) term uses sq_dist directly (dist**2 == sq_dist up to rounding).
    per_pair = (1.0 - label) * sq_dist + label * (margin_dist * margin_dist)

    # Mask rows past the true batch size (zero-padded final tile).
    row_ids = jax.lax.broadcasted_iota(jnp.int32, per_pair.shape, 0) + i * tile_b
    per_pair = jnp.where(row_ids < true_b, per_pair, 0.0)

    acc_ref[0] += jnp.sum(per_pair)

    @pl.when(i == pl.num_programs(0) - 1)
    def _finalize():
        loss_ref[0] = acc_ref[0] / jnp.float32(true_b)


def _choose_tile_b(b: int, d: int, itemsize: int) -> int:
    """~1 MiB per input block, rows a multiple of 8, never larger than needed."""
    target_bytes = 1 << 20
    tb = target_bytes // max(1, d * itemsize)
    tb = max(8, min(tb, 4096))
    tb = (tb // 8) * 8
    b_rounded = ((b + 7) // 8) * 8
    return min(tb, b_rounded)


def contrastive_loss(output1, output2, label, margin=2.0, tile_b=None):
    """output1, output2: (B, D); label: (B,) or (B, 1). Returns scalar f32 loss."""
    B, D = output1.shape
    label = label.reshape(B, 1)

    tb = _choose_tile_b(B, D, output1.dtype.itemsize) if tile_b is None else int(tile_b)
    assert tb % 8 == 0, "tile_b must be a multiple of 8"

    b_pad = ((B + tb - 1) // tb) * tb
    if b_pad != B:
        pad = b_pad - B
        output1 = jnp.pad(output1, ((0, pad), (0, 0)))
        output2 = jnp.pad(output2, ((0, pad), (0, 0)))
        label = jnp.pad(label, ((0, pad), (0, 0)))

    grid = (b_pad // tb,)
    kernel = functools.partial(
        _contrastive_loss_kernel, true_b=B, tile_b=tb, margin=float(margin))

    out = pl.pallas_call(
        kernel,
        out_shape=jax.ShapeDtypeStruct((1,), jnp.float32),
        grid=grid,
        in_specs=[
            pl.BlockSpec((tb, D), lambda i: (i, 0)),
            pl.BlockSpec((tb, D), lambda i: (i, 0)),
            pl.BlockSpec((tb, 1), lambda i: (i, 0)),
        ],
        # Scalar output lives in SMEM, resident across the whole (reduction) grid.
        out_specs=pl.BlockSpec(memory_space=pltpu.SMEM),
        scratch_shapes=[pltpu.SMEM((1,), jnp.float32)],
        compiler_params=pltpu.CompilerParams(dimension_semantics=("arbitrary",)),
    )(output1, output2, label)
    return out[0]


def _reference(output1, output2, label, margin=2.0):
    # Pure-JAX reference mirroring the torch module.
    diff = output1.astype(jnp.float32) - output2.astype(jnp.float32) + _EPS
    dist = jnp.sqrt(jnp.sum(diff * diff, axis=-1, keepdims=True))
    md = jnp.maximum(margin - dist, 0.0)
    lbl = label.reshape(-1, 1).astype(jnp.float32)
    return jnp.mean((1.0 - lbl) * dist**2 + lbl * md**2)


if __name__ == "__main__":
    key = jax.random.PRNGKey(0)
    k1, k2, k3, k4, k5, k6 = jax.random.split(key, 6)

    # Case 1: small batch, single tile.
    B, D = 8, 32
    o1 = jax.random.normal(k1, (B, D), dtype=jnp.float32)
    o2 = jax.random.normal(k2, (B, D), dtype=jnp.float32)
    lbl = jax.random.bernoulli(k3, 0.5, (B, 1)).astype(jnp.float32)

    loss = jax.block_until_ready(contrastive_loss(o1, o2, lbl))
    ref = _reference(o1, o2, lbl)
    assert jnp.allclose(loss, ref, rtol=1e-5, atol=1e-5), (loss, ref)

    # Case 2: forces multiple grid steps + a masked partial final tile.
    B2, D2 = 50, 32
    o1b = jax.random.normal(k4, (B2, D2), dtype=jnp.float32)
    o2b = jax.random.normal(k5, (B2, D2), dtype=jnp.float32)
    lblb = jax.random.bernoulli(k6, 0.5, (B2, 1)).astype(jnp.float32)

    loss2 = jax.block_until_ready(contrastive_loss(o1b, o2b, lblb, tile_b=16))
    ref2 = _reference(o1b, o2b, lblb)
    assert jnp.allclose(loss2, ref2, rtol=1e-5, atol=1e-5), (loss2, ref2)

    print("KERNEL_OK")
</pallas_src>

<mosaic_0001>
module attributes {stable_mosaic.version = 11 : i64} {
  func.func @_contrastive_loss_kernel(%arg0: i32, %arg1: memref<8x32xf32, #tpu.memory_space<vmem>>, %arg2: memref<8x32xf32, #tpu.memory_space<vmem>>, %arg3: memref<8x1xf32, #tpu.memory_space<vmem>>, %arg4: memref<1xf32, #tpu.memory_space<smem>>, %arg5: memref<1xf32, #tpu.memory_space<smem>>) attributes {dimension_semantics = [#tpu.dimension_semantics<arbitrary>], iteration_bounds = array<i64: 1>, scalar_prefetch = 0 : i64, scratch_operands = 1 : i64, tpu.core_type = #tpu.core_type<tc>, window_params = [{transform_indices = @transform_0, window_bounds = array<i64: 8, 32>}, {transform_indices = @transform_1, window_bounds = array<i64: 8, 32>}, {transform_indices = @transform_2, window_bounds = array<i64: 8, 1>}, {transform_indices = @transform_3, window_bounds = array<i64: 1>}]} {
    %c0_i32 = arith.constant 0 : i32
    %0 = arith.cmpi eq, %arg0, %c0_i32 : i32
    %1 = arith.extui %0 : i1 to i32
    %c0_i32_0 = arith.constant 0 : i32
    %2 = arith.cmpi ne, %1, %c0_i32_0 : i32
    scf.if %2 {
      %cst_17 = arith.constant 0.000000e+00 : f32
      %c0_18 = arith.constant 0 : index
      %41 = memref.load %arg5[%c0_18] : memref<1xf32, #tpu.memory_space<smem>>
      memref.store %cst_17, %arg5[%c0_18] : memref<1xf32, #tpu.memory_space<smem>>
    } else {
    }
    %c0 = arith.constant 0 : index
    %c0_1 = arith.constant 0 : index
    %3 = vector.load %arg1[%c0, %c0_1] : memref<8x32xf32, #tpu.memory_space<vmem>>, vector<8x32xf32>
    %c0_2 = arith.constant 0 : index
    %c0_3 = arith.constant 0 : index
    %4 = vector.load %arg2[%c0_2, %c0_3] : memref<8x32xf32, #tpu.memory_space<vmem>>, vector<8x32xf32>
    %c0_4 = arith.constant 0 : index
    %c0_5 = arith.constant 0 : index
    %5 = vector.load %arg3[%c0_4, %c0_5] : memref<8x1xf32, #tpu.memory_space<vmem>>, vector<8x1xf32>
    %6 = arith.subf %3, %4 : vector<8x32xf32>
    %cst = arith.constant 9.99999997E-7 : f32
    %7 = vector.broadcast %cst : f32 to vector<8x32xf32>
    %8 = arith.addf %6, %7 : vector<8x32xf32>
    %9 = arith.mulf %8, %8 : vector<8x32xf32>
    %cst_6 = arith.constant dense<0.000000e+00> : vector<8xf32>
    %10 = vector.multi_reduction <add>, %9, %cst_6 [1] : vector<8x32xf32> to vector<8xf32>
    %11 = vector.shape_cast %10 : vector<8xf32> to vector<8x1xf32>
    %12 = math.sqrt %11 : vector<8x1xf32>
    %cst_7 = arith.constant 2.000000e+00 : f32
    %13 = vector.broadcast %cst_7 : f32 to vector<8x1xf32>
    %14 = arith.subf %13, %12 : vector<8x1xf32>
    %cst_8 = arith.constant 0.000000e+00 : f32
    %15 = vector.broadcast %cst_8 : f32 to vector<8x1xf32>
    %16 = arith.maximumf %14, %15 : vector<8x1xf32>
    %cst_9 = arith.constant 1.000000e+00 : f32
    %17 = vector.broadcast %cst_9 : f32 to vector<8x1xf32>
    %18 = arith.subf %17, %5 : vector<8x1xf32>
    %19 = arith.mulf %18, %11 : vector<8x1xf32>
    %20 = arith.mulf %16, %16 : vector<8x1xf32>
    %21 = arith.mulf %5, %20 : vector<8x1xf32>
    %22 = arith.addf %19, %21 : vector<8x1xf32>
    %23 = tpu.iota {dimensions = array<i32: 0>} : vector<8x1xi32>
    %c8_i32 = arith.constant 8 : i32
    %24 = arith.muli %arg0, %c8_i32 : i32
    %25 = vector.broadcast %24 : i32 to vector<8x1xi32>
    %26 = arith.addi %23, %25 : vector<8x1xi32>
    %c8_i32_10 = arith.constant 8 : i32
    %27 = vector.broadcast %c8_i32_10 : i32 to vector<8x1xi32>
    %28 = arith.cmpi slt, %26, %27 : vector<8x1xi32>
    %cst_11 = arith.constant 0.000000e+00 : f32
    %29 = vector.broadcast %cst_11 : f32 to vector<8x1xf32>
    %30 = arith.select %28, %22, %29 : vector<8x1xi1>, vector<8x1xf32>
    %c0_12 = arith.constant 0 : index
    %31 = memref.load %arg5[%c0_12] : memref<1xf32, #tpu.memory_space<smem>>
    %32 = vector.shape_cast %30 : vector<8x1xf32> to vector<1x8x1xf32>
    %cst_13 = arith.constant dense<0.000000e+00> : vector<1xf32>
    %33 = vector.multi_reduction <add>, %32, %cst_13 [1, 2] : vector<1x8x1xf32> to vector<1xf32>
    %34 = vector.shape_cast %33 : vector<1xf32> to vector<1x1x1xf32>
    %35 = vector.extract %34[0, 0, 0] : f32 from vector<1x1x1xf32>
    %36 = arith.addf %31, %35 : f32
    %c0_14 = arith.constant 0 : index
    %37 = memref.load %arg5[%c0_14] : memref<1xf32, #tpu.memory_space<smem>>
    memref.store %36, %arg5[%c0_14] : memref<1xf32, #tpu.memory_space<smem>>
    %c0_i32_15 = arith.constant 0 : i32
    %38 = arith.cmpi eq, %arg0, %c0_i32_15 : i32
    %39 = arith.extui %38 : i1 to i32
    %c0_i32_16 = arith.constant 0 : i32
    %40 = arith.cmpi ne, %39, %c0_i32_16 : i32
    scf.if %40 {
      %c0_17 = arith.constant 0 : index
      %41 = memref.load %arg5[%c0_17] : memref<1xf32, #tpu.memory_space<smem>>
      %cst_18 = arith.constant 8.000000e+00 : f32
      %42 = arith.divf %41, %cst_18 : f32
      %c0_19 = arith.constant 0 : index
      %43 = memref.load %arg4[%c0_19] : memref<1xf32, #tpu.memory_space<smem>>
      memref.store %42, %arg4[%c0_19] : memref<1xf32, #tpu.memory_space<smem>>
    } else {
    }
    return
  }
  func.func @transform_0(%arg0: i32) -> (i32, i32) {
    %c0_i32 = arith.constant 0 : i32
    %c0_i32_0 = arith.constant 0 : i32
    return %arg0, %c0_i32 : i32, i32
  }
  func.func @transform_1(%arg0: i32) -> (i32, i32) {
    %c0_i32 = arith.constant 0 : i32
    %c0_i32_0 = arith.constant 0 : i32
    return %arg0, %c0_i32 : i32, i32
  }
  func.func @transform_2(%arg0: i32) -> (i32, i32) {
    %c0_i32 = arith.constant 0 : i32
    %c0_i32_0 = arith.constant 0 : i32
    return %arg0, %c0_i32 : i32, i32
  }
  func.func @transform_3(%arg0: i32) -> i32 {
    %c0_i32 = arith.constant 0 : i32
    %c0_i32_0 = arith.constant 0 : i32
    return %c0_i32 : i32
  }
}

</mosaic_0001>

<bundles_post_ra>
// kernel: tpu_custom_call.1
= control target key start
LH: loop header
LB: loop body
LE: loop exit
PB: predicated region body
PF: predicated region fallthrough
CT: control target
= control target key end

     0   :  { %8 = vsyncpa [#allocation4], 0  ;;  %s196_s0 = inlined_call_operand.vmem [shape: f32[8,32], index: 0, kind: input, shape index: {}]   ;;  %s197_s1 = inlined_call_operand.hbm [shape: f32[8,32], index: 1, kind: input, shape index: {}]   ;;  %s198_s2 = inlined_call_operand.vmem [shape: f32[8,1], index: 2, kind: input, shape index: {}]   ;;  %s199_s3 = inlined_call_operand.hbm [shape: f32[1], index: 3, kind: output, shape index: {}]  }
   0x1   :  { %9 = vsyncpa [#allocation5], 0  ;;  %s144_s12 = smov [#allocation3]   ;;  %s108_s16 = scalar_lea.hbm %s197_s1, 128 }
   0x2   :  { %s18_s13 = sshll.u32 %s144_s12, 4  ;;  %p109_p0 = scmp.ne.s32.totalorder %s197_s1, %s108_s16  ;;  %s19_s13 = int_to_ptr.vmem [resolvable:$true] %s18_s13 }
   0x3   :  { %p112_p1 = scmp.lt.u32.totalorder %s108_s16, %s197_s1 }
   0x5   :  { %p114_p2 = pnand %p112_p1, %p109_p0 }
   0x7   :  { %117 = shalt.err (!%p114_p2)
}
   0x8   :  { %s118_s21 = scalar_lea.vmem %s19_s13, 128  ;;  %p123_p4 = scmp.lt.s32.totalorder %s19_s13, %s19_s13 }
   0x9   :  { %p119_p3 = scmp.ne.s32.totalorder %s19_s13, %s118_s21  ;;  %p124_p5 = scmp.lt.s32.totalorder %s118_s21, %s118_s21 }
   0xb   :  { %p125_p6 = por %p124_p5, %p123_p4 }
   0xd   :  { %p126_p7 = pnand %p125_p6, %p119_p3 }
   0xf   :  { %129 = shalt.err (!%p126_p7)
}
  0x10   :  { %21 = dma.hbm_to_vmem [thread:$0]  %s197_s1, 128, %s19_s13, [#allocation4]  }
  0x11   :  { %140 = dma.done.wait [#allocation4], 128  }
  0x12   :  { %141 = vsyncadd [#allocation4], 4294967168  ;;  %v33_v0 = vld [vmem:[%s196_s0] sm:$0xff]  ;;  %vm39_vm0 = vcmask 261120   ;;  %vm65_vm3 = vcmask 7168   ;;  %s130_s29 = scalar_lea.hbm %s199_s3, 16 }
  0x13   :  { %v34_v1 = vld [vmem:[#allocation3] sm:$0xff]  ;;  %p131_p8 = scmp.ne.s32.totalorder %s199_s3, %s130_s29  ;;  %p134_p9 = scmp.lt.u32.totalorder %s130_s29, %s199_s3 }
  0x14   :  { %v36_v2 = vsub.f32 %v33_v0, %v34_v1  ;;  %v35_v11 = vld [vmem:[%s198_s2] sm:$0xff] }
  0x15   :  { %v52_v15 = vsub.f32 1.0, %v35_v11  ;;  %p136_p10 = pnand %p134_p9, %p131_p8 }
  0x16   :  { %v37_v3 = vadd.f32 1e-06, %v36_v2 }
  0x18   :  { %v38_v4 = vmul.f32 %v37_v3, %v37_v3 }
  0x1a   :  { %v40_v5 = vsel %vm39_vm0, %v38_v4, 0.0 }
  0x1b   :  { %41 = vadd.xlane.f32.xlu0 %v40_v5 }
  0xa8   :  { %v42_v6 = vpop.xlane.xlu0 %41 }
  0xa9   :  { %106 = vrsqrt.f32 %v42_v6  ;;  %vm45_vm1 = vcmp.eq.f32.partialorder %v42_v6, inf  ;;  %v48_v9 = vand.u32 2147483648, %v42_v6  ;;  %vm47_vm2 = vcmp.eq.f32.partialorder %v42_v6, 0.0 }
  0xaa   :  { %v53_v17 = vmul.f32 %v52_v15, %v42_v6 }
  0xb3   :  { %v107_v7 = vpop.eup %106 }
  0xb4   :  { %v44_v8 = vmul.f32 %v107_v7, %v42_v6 }
  0xb6   :  { %v46_v10 = vsel %vm45_vm1, %v42_v6, %v44_v8 }
  0xb7   :  { %v49_v12 = vsel %vm47_vm2, %v48_v9, %v46_v10 }
  0xb8   :  { %v50_v13 = vsub.f32 2.0, %v49_v12 }
  0xba   :  { %v51_v14 = vmax.f32 %v50_v13, 0.0 }
  0xbc   :  { %v54_v16 = vmul.f32 %v51_v14, %v51_v14 }
  0xbe   :  { %v55_v18 = vmul.f32 %v54_v16, %v35_v11 }
  0xc0   :  { %v56_v19 = vadd.f32 %v55_v18, %v53_v17 }
  0xc2   :  { %v66_v20 = vsel %vm65_vm3, %v56_v19, 0.0 }
  0xc3   :  { %67 = vadd.xlane.f32.xlu0 %v66_v20 }
 0x150   :  { %v68_v21 = vpop.xlane.xlu0 %67 }
 0x151   :  { %v69_v22 = vrot.slane %v68_v21, 4 }
 0x153   :  { %v70_v23 = vadd.f32 %v69_v22, %v68_v21 }
 0x155   :  { %v71_v24 = vrot.slane %v70_v23, 2 }
 0x157   :  { %v72_v25 = vadd.f32 %v71_v24, %v70_v23 }
 0x159   :  { %v73_v26 = vrot.slane %v72_v25, 1 }
 0x15b   :  { %v74_v27 = vadd.f32 %v73_v26, %v72_v25 }
 0x15d   :  { %102 = vpush %v74_v27 }
 0x18e   :  { %s103_s0 = spop %102 }
 0x18f   :  { %s85_s2 = smul.f32 0.125, %s103_s0 }
 0x191   :  { %87 = sst [smem:[#allocation6]] %s85_s2 }
 0x192   :  { %139 = shalt.err (!%p136_p10)
}
 0x193   :  { %s145_s7 = smov [#allocation6]  }
 0x194   :  { %95 = dma.smem_to_hbm %s145_s7, 16, %s199_s3, [#allocation5]  }
 0x195   :  { %142 = dma.done.wait [#allocation5], 16  }
 0x196   :  { %143 = vsyncadd [#allocation5], 4294967280 }
 0x197   :  { %99 = sfence }
 0x198   :  { %100 = vsyncpa [#allocation4], 1 }
 0x199   :  { %101 = vsyncpa [#allocation5], 1 }

</bundles_post_ra>
